<compile_context>
chip_gen: v7x
topology: tpu7x:2x2x1
jax: 0.10.0
libtpu: 0.0.40
codegen_flags: <defaults>
</compile_context>

<pallas_src>
import functools
import math

import jax
import jax.numpy as jnp
from jax.experimental import pallas as pl
from jax.experimental.pallas import tpu as pltpu


def _round_up(x, m):
    return ((x + m - 1) // m) * m


def _default_tile_config():
    """Pick (tm, tn, tk, vmem_limit_bytes) from the chip's VMEM capacity."""
    try:
        vmem_cap = int(pltpu.get_tpu_info().vmem_capacity_bytes)
    except Exception:
        vmem_cap = 64 * 1024 * 1024  # conservative (v7x-sized) fallback
    if vmem_cap >= 100 * 1024 * 1024:
        # v5e / v6e: 128 MiB VMEM -> large output tiles (~682 FLOP/B on v6e)
        return 1024, 2048, 1024, 96 * 1024 * 1024
    # v7x: 64 MiB VMEM per TensorCore -> smaller budget, still > ~310 FLOP/B
    return 512, 1024, 1024, 48 * 1024 * 1024


def _full_k_fits(tm, tn, k_pad, vmem_limit):
    """Can we keep the whole K dimension resident (single K step)?"""
    # double-buffered 16-bit x and w tiles + double-buffered 16-bit out tile
    need = 2 * (tm * k_pad + k_pad * tn) * 2 + 2 * tm * tn * 2
    return need <= int(vmem_limit * 0.75)


# --------------------------------------------------------------------------
# Kernels
# --------------------------------------------------------------------------

def _linear_bias_kernel(x_ref, w_ref, b_ref, o_ref):
    # Single K step: o = x @ w + b. No accumulator scratch needed.
    acc = jnp.dot(x_ref[...], w_ref[...], preferred_element_type=jnp.float32)
    o_ref[...] = (acc + b_ref[...]).astype(o_ref.dtype)


def _linear_bias_acc_kernel(x_ref, w_ref, b_ref, o_ref, acc_ref):
    # K is the last ("arbitrary") grid axis; acc_ref persists across K steps.
    # Only used when num_programs(2) >= 2.
    k = pl.program_id(2)
    nk = pl.num_programs(2)
    p = jnp.dot(x_ref[...], w_ref[...], preferred_element_type=jnp.float32)

    @pl.when(k == 0)
    def _():
        acc_ref[...] = p                       # no zero-init + add

    @pl.when(jnp.logical_and(k > 0, k < nk - 1))
    def _():
        acc_ref[...] += p

    @pl.when(k == nk - 1)
    def _():
        # Fold the last partial product and the bias directly into the output
        # store: skips the final accumulator store/reload.
        o_ref[...] = (acc_ref[...] + p + b_ref[...]).astype(o_ref.dtype)


# --------------------------------------------------------------------------
# Forward wrapper
# --------------------------------------------------------------------------

@functools.partial(
    jax.jit,
    static_argnames=("out_features", "tm", "tn", "tk", "compute_dtype",
                     "vmem_limit"))
def _mixlinear_forward(x, w_kn, b, *, out_features, tm, tn, tk,
                       compute_dtype, vmem_limit):
    """y = x @ W.T + b given a pre-padded (K_pad, N_pad) weight and (1, N_pad)
    f32 bias. Returns fp16, shape (..., out_features)."""
    lead_shape = x.shape[:-1]
    in_features = x.shape[-1]
    m = math.prod(lead_shape) if lead_shape else 1

    if m == 0:
        return jnp.zeros(lead_shape + (out_features,), dtype=jnp.float16)

    k_pad, n_pad = w_kn.shape
    x2d = x.reshape(m, in_features).astype(compute_dtype)

    # M tile: clamp for small problems; multiples of 16 for 16-bit sublane
    # packing (two rows per sublane).
    tm_ = min(tm, _round_up(m, 16))
    m_pad = _round_up(m, tm_)
    if (m_pad, k_pad) != (m, in_features):
        x2d = jnp.pad(x2d, ((0, m_pad - m), (0, k_pad - in_features)))

    tn_ = tn
    gm = m_pad // tm_
    # v7x megacore: if M and N both fit in one block, split N so both
    # TensorCores get work (harmless elsewhere).
    if gm == 1 and n_pad == tn_ and tn_ % 256 == 0:
        tn_ //= 2
    gn = n_pad // tn_
    gk = k_pad // tk

    out_shape = jax.ShapeDtypeStruct((m_pad, n_pad), compute_dtype)

    if gk == 1:
        # K axis collapsed: no accumulator, no init/finalize branches.
        y_pad = pl.pallas_call(
            _linear_bias_kernel,
            out_shape=out_shape,
            grid=(gm, gn),
            in_specs=[
                pl.BlockSpec((tm_, k_pad), lambda i, j: (i, 0)),   # x
                pl.BlockSpec((k_pad, tn_), lambda i, j: (0, j)),   # W (K, N)
                pl.BlockSpec((1, tn_), lambda i, j: (0, j)),       # bias (f32)
            ],
            out_specs=pl.BlockSpec((tm_, tn_), lambda i, j: (i, j)),
            compiler_params=pltpu.CompilerParams(
                dimension_semantics=("parallel", "parallel"),
                vmem_limit_bytes=vmem_limit),
        )(x2d, w_kn, b)
    else:
        y_pad = pl.pallas_call(
            _linear_bias_acc_kernel,
            out_shape=out_shape,
            grid=(gm, gn, gk),
            in_specs=[
                pl.BlockSpec((tm_, tk), lambda i, j, k: (i, k)),   # x
                pl.BlockSpec((tk, tn_), lambda i, j, k: (k, j)),   # W (K, N)
                pl.BlockSpec((1, tn_), lambda i, j, k: (0, j)),    # bias (f32)
            ],
            out_specs=pl.BlockSpec((tm_, tn_), lambda i, j, k: (i, j)),
            scratch_shapes=[pltpu.VMEM((tm_, tn_), jnp.float32)],
            compiler_params=pltpu.CompilerParams(
                dimension_semantics=("parallel", "parallel", "arbitrary"),
                vmem_limit_bytes=vmem_limit),
        )(x2d, w_kn, b)

    # Slice off padding and produce the module's fp16 output dtype; XLA fuses
    # the convert with this slice, so it adds no extra pass over the output.
    y2d = y_pad[:m, :out_features].astype(jnp.float16)
    return y2d.reshape(*lead_shape, out_features)


class MixLinearGEMM:
    """JAX/Pallas port of MixLinear_GEMM.forward: y = x @ W.T + b (fp16 params).

    Weight-side preparation (cast to the MXU compute dtype, one-time transpose
    to (K, N), zero-pad to tile multiples, bias to f32) happens once at
    construction — it is static across inference calls and stays off the
    per-call path.
    """

    def __init__(self, weight, bias=None, *, tm=None, tn=None, tk=None,
                 compute_dtype=jnp.bfloat16):
        out_features, in_features = weight.shape
        self.out_features = int(out_features)
        self.in_features = int(in_features)
        self.compute_dtype = compute_dtype

        tm_d, tn_d, tk_d, vmem_limit = _default_tile_config()
        self.vmem_limit = int(vmem_limit)
        self.tm = int(tm if tm is not None else tm_d)
        tn_sel = int(tn if tn is not None else tn_d)
        tk_sel = int(tk if tk is not None else tk_d)

        # Lane-dense tiles: clamp to the padded problem size (multiples of 128).
        self.tn = min(tn_sel, _round_up(self.out_features, 128))
        tk_sel = min(tk_sel, _round_up(self.in_features, 128))

        # If the whole padded K fits in VMEM next to the other tiles, collapse
        # the K grid axis entirely (no accumulator RMW, fewer grid steps).
        k_full = _round_up(self.in_features, 128)
        if tk is None and _full_k_fits(self.tm, self.tn, k_full, self.vmem_limit):
            tk_sel = k_full
        self.tk = tk_sel

        n_pad = _round_up(self.out_features, self.tn)
        k_pad = _round_up(self.in_features, self.tk)

        # One-time: cast + transpose to (K, N) + zero-pad (zero K rows
        # contribute 0 to the dot; extra N columns are sliced off at the end).
        w_kn = jnp.asarray(weight).astype(compute_dtype).T
        if (k_pad, n_pad) != w_kn.shape:
            w_kn = jnp.pad(w_kn, ((0, k_pad - self.in_features),
                                  (0, n_pad - self.out_features)))
        self.w_kn = w_kn

        if bias is None:
            b = jnp.zeros((1, n_pad), dtype=jnp.float32)
        else:
            b = jnp.asarray(bias).astype(jnp.float32).reshape(1, self.out_features)
            if n_pad != self.out_features:
                b = jnp.pad(b, ((0, 0), (0, n_pad - self.out_features)))
        self.bias = b

        # TODO(synk): the module's host-side output-reuse cache (cnt / y1 /
        # last_input / reuse_output_because_of_zeros_input) is Python
        # bookkeeping that never changes the math of a fresh call; the unused
        # quantization buffers (q_weight, q_scale_col, scale_history) are also
        # never touched by forward. Neither is reproduced here.

    def __call__(self, x):
        return _mixlinear_forward(
            x, self.w_kn, self.bias,
            out_features=self.out_features,
            tm=self.tm, tn=self.tn, tk=self.tk,
            compute_dtype=self.compute_dtype,
            vmem_limit=self.vmem_limit)


def mixlinear_gemm_forward(x, weight, bias=None, **kwargs):
    """Functional convenience wrapper (prefer MixLinearGEMM for repeated calls)."""
    return MixLinearGEMM(weight, bias, **kwargs)(x)


def _init_params(key, in_features, out_features):
    """Deterministic init matching nn.Linear-style kaiming_uniform_(a=sqrt(5))."""
    kw, kb = jax.random.split(key)
    bound = 1.0 / (in_features ** 0.5)
    weight = jax.random.uniform(
        kw, (out_features, in_features), dtype=jnp.float32,
        minval=-bound, maxval=bound).astype(jnp.float16)
    bias = jax.random.uniform(
        kb, (out_features,), dtype=jnp.float32,
        minval=-bound, maxval=bound).astype(jnp.float16)
    return weight, bias


if __name__ == "__main__":
    key = jax.random.PRNGKey(0)
    k1, k2, k3, k4 = jax.random.split(key, 4)

    # ---- Test 1: small shapes implied by the module's 3-D forward -----------
    # (single-K path: K axis collapsed, no accumulator scratch)
    batch, seq, in_f, out_f = 2, 8, 32, 64
    x = jax.random.normal(k1, (batch, seq, in_f), dtype=jnp.float32)
    x = x.astype(jnp.float16)
    weight, bias = _init_params(k2, in_f, out_f)

    layer = MixLinearGEMM(weight, bias)
    y = jax.block_until_ready(layer(x))

    y_ref = (jnp.einsum("bsk,nk->bsn", x.astype(jnp.float32),
                        weight.astype(jnp.float32))
             + bias.astype(jnp.float32)).astype(jnp.float16)
    assert y.shape == (batch, seq, out_f)
    assert y.dtype == jnp.float16
    assert jnp.allclose(y.astype(jnp.float32), y_ref.astype(jnp.float32),
                        atol=3e-2, rtol=3e-2)

    # ---- Test 2: force the multi-K (f32 accumulator) path with tiny tiles ---
    batch2, seq2, in_f2, out_f2 = 2, 16, 384, 256
    x2 = jax.random.normal(k3, (batch2, seq2, in_f2), dtype=jnp.float32)
    x2 = x2.astype(jnp.float16)
    weight2, bias2 = _init_params(k4, in_f2, out_f2)

    layer2 = MixLinearGEMM(weight2, bias2, tm=16, tn=128, tk=128)  # gk = 3
    y2 = jax.block_until_ready(layer2(x2))

    y2_ref = (jnp.einsum("bsk,nk->bsn", x2.astype(jnp.float32),
                         weight2.astype(jnp.float32))
              + bias2.astype(jnp.float32)).astype(jnp.float16)
    assert y2.shape == (batch2, seq2, out_f2)
    assert y2.dtype == jnp.float16
    assert jnp.allclose(y2.astype(jnp.float32), y2_ref.astype(jnp.float32),
                        atol=4e-2, rtol=4e-2)

    print("KERNEL_OK")
</pallas_src>

<mosaic_0001>
module attributes {stable_mosaic.version = 11 : i64} {
  func.func @_linear_bias_kernel(%arg0: i32, %arg1: i32, %arg2: memref<16x128xbf16, #tpu.memory_space<vmem>>, %arg3: memref<128x128xbf16, #tpu.memory_space<vmem>>, %arg4: memref<1x128xf32, #tpu.memory_space<vmem>>, %arg5: memref<16x128xbf16, #tpu.memory_space<vmem>>) attributes {dimension_semantics = [#tpu.dimension_semantics<parallel>, #tpu.dimension_semantics<parallel>], iteration_bounds = array<i64: 1, 1>, scalar_prefetch = 0 : i64, scratch_operands = 0 : i64, tpu.core_type = #tpu.core_type<tc>, window_params = [{transform_indices = @transform_0, window_bounds = array<i64: 16, 128>}, {transform_indices = @transform_1, window_bounds = array<i64: 128, 128>}, {transform_indices = @transform_2, window_bounds = array<i64: 1, 128>}, {transform_indices = @transform_3, window_bounds = array<i64: 16, 128>}]} {
    %c0 = arith.constant 0 : index
    %c0_0 = arith.constant 0 : index
    %0 = vector.load %arg2[%c0, %c0_0] : memref<16x128xbf16, #tpu.memory_space<vmem>>, vector<16x128xbf16>
    %c0_1 = arith.constant 0 : index
    %c0_2 = arith.constant 0 : index
    %1 = vector.load %arg3[%c0_1, %c0_2] : memref<128x128xbf16, #tpu.memory_space<vmem>>, vector<128x128xbf16>
    %cst = arith.constant dense<0.000000e+00> : vector<16x128xf32>
    %2 = tpu.matmul %0, %1, %cst {dimension_numbers = #tpu.dot_dimension_numbers<[1], [0], [0], [1], [0, 0, 1, 1], [], []>} : vector<16x128xbf16>, vector<128x128xbf16>, vector<16x128xf32> -> vector<16x128xf32>
    %c0_3 = arith.constant 0 : index
    %c0_4 = arith.constant 0 : index
    %3 = vector.load %arg4[%c0_3, %c0_4] : memref<1x128xf32, #tpu.memory_space<vmem>>, vector<1x128xf32>
    %4 = vector.broadcast %3 : vector<1x128xf32> to vector<16x128xf32>
    %5 = arith.addf %2, %4 : vector<16x128xf32>
    %6 = arith.truncf %5 : vector<16x128xf32> to vector<16x128xbf16>
    %c0_5 = arith.constant 0 : index
    %c0_6 = arith.constant 0 : index
    %7 = vector.load %arg5[%c0_5, %c0_6] : memref<16x128xbf16, #tpu.memory_space<vmem>>, vector<16x128xbf16>
    tpu.vector_store %arg5[%c0_5, %c0_6], %6 {strides = array<i32>} : memref<16x128xbf16, #tpu.memory_space<vmem>>, vector<16x128xbf16>,
    return
  }
  func.func @transform_0(%arg0: i32, %arg1: i32) -> (i32, i32) {
    %c0_i32 = arith.constant 0 : i32
    %c0_i32_0 = arith.constant 0 : i32
    return %arg0, %c0_i32 : i32, i32
  }
  func.func @transform_1(%arg0: i32, %arg1: i32) -> (i32, i32) {
    %c0_i32 = arith.constant 0 : i32
    %c0_i32_0 = arith.constant 0 : i32
    return %c0_i32, %arg1 : i32, i32
  }
  func.func @transform_2(%arg0: i32, %arg1: i32) -> (i32, i32) {
    %c0_i32 = arith.constant 0 : i32
    %c0_i32_0 = arith.constant 0 : i32
    return %c0_i32, %arg1 : i32, i32
  }
  func.func @transform_3(%arg0: i32, %arg1: i32) -> (i32, i32) {
    %c0_i32 = arith.constant 0 : i32
    return %arg0, %arg1 : i32, i32
  }
}

</mosaic_0001>

<bundles_post_ra>
// kernel: _mixlinear_forward.1
= control target key start
LH: loop header
LB: loop body
LE: loop exit
PB: predicated region body
PF: predicated region fallthrough
CT: control target
= control target key end

     0   :  { %8 = vsyncpa [#allocation3], 0  ;;  %s250_s12 = smov [#allocation2]   ;;  %s296_s0 = inlined_call_operand.vmem [shape: bf16[16,128], index: 0, kind: input, shape index: {}]   ;;  %s297_s1 = inlined_call_operand.hbm [shape: bf16[128,128], index: 1, kind: input, shape index: {}]   ;;  %s298_s2 = inlined_call_operand.vmem [shape: f32[1,128], index: 2, kind: input, shape index: {}]   ;;  %s299_s3 = inlined_call_operand.vmem [shape: bf16[16,128], index: 3, kind: output, shape index: {}]  }
   0x1   :  { %s16_s13 = sshll.u32 %s250_s12, 4  ;;  %s226_s16 = scalar_lea.hbm %s297_s1, 1024  ;;  %s17_s13 = int_to_ptr.vmem [resolvable:$true] %s16_s13 }
   0x2   :  { %p227_p0 = scmp.ne.s32.totalorder %s297_s1, %s226_s16  ;;  %p230_p1 = scmp.lt.u32.totalorder %s226_s16, %s297_s1 }
   0x4   :  { %p232_p2 = pnand %p230_p1, %p227_p0 }
   0x6   :  { %235 = shalt.err (!%p232_p2)
}
   0x7   :  { %s236_s21 = scalar_lea.vmem %s17_s13, 1024  ;;  %p241_p4 = scmp.lt.s32.totalorder %s17_s13, %s17_s13 }
   0x8   :  { %p237_p3 = scmp.ne.s32.totalorder %s17_s13, %s236_s21  ;;  %p242_p5 = scmp.lt.s32.totalorder %s236_s21, %s236_s21 }
   0xa   :  { %p243_p6 = por %p242_p5, %p241_p4 }
   0xc   :  { %p244_p7 = pnand %p243_p6, %p237_p3 }
   0xe   :  { %247 = shalt.err (!%p244_p7)
}
   0xf   :  { %s251_s22 = smov 64   ;;  %s252_s23 = smov 4  }
  0x10   :  { %22 = dma.hbm_to_vmem [thread:$0]  %s297_s1, 1024, %s17_s13, [#allocation3], %s251_s22, %s251_s22, %s252_s23  }
  0x11   :  { %248 = dma.done.wait [#allocation3], 1024  }
  0x12   :  { %249 = vsyncadd [#allocation3], 4294966272  ;;  %v253_v0 = vmov 0.0   ;;  %vm254_vm0 = vmmov 0   ;;  %v217_v1 = vld [vmem:[#allocation2] sm:$0xff]   ;;  %v218_v2 = vld [vmem:[#allocation2 + $0x8] sm:$0xff]  }
  0x13   :  { %192 = vmatprep.subr.bf16.mxu0 %v253_v0  ;;  %208 = vmatprep.mubr.msk.bf16.mxu0 %vm254_vm0, %v253_v0  ;;  %v219_v3 = vld [vmem:[#allocation2 + $0x10] sm:$0xff]   ;;  %v220_v4 = vld [vmem:[#allocation2 + $0x18] sm:$0xff]   ;;  %v221_v5 = vld [vmem:[#allocation2 + $0x20] sm:$0xff]  }
  0x14   :  { %193 = vmatpush3.bf16.msra.mxu0 %v217_v1  ;;  %v222_v6 = vld [vmem:[#allocation2 + $0x28] sm:$0xff]   ;;  %v223_v7 = vld [vmem:[#allocation2 + $0x30] sm:$0xff]   ;;  %v224_v8 = vld [vmem:[#allocation2 + $0x38] sm:$0xff]  }
  0x15   :  { %194 = vmatprep.subr.bf16.mxu0 %v253_v0  ;;  %v225_v9 = vld [vmem:[%s296_s0] sm:$0xff]  }
  0x16   :  { %v164_v10 = vld [vmem:[%s298_s2] ss:$0 sm:$0xff] }
  0x18   :  { %195 = vmatpush3.bf16.msra.mxu0 %v218_v2 }
  0x19   :  { %196 = vmatprep.subr.bf16.mxu0 %v253_v0 }
  0x1c   :  { %197 = vmatpush3.bf16.msra.mxu0 %v219_v3 }
  0x1d   :  { %198 = vmatprep.subr.bf16.mxu0 %v253_v0 }
  0x20   :  { %199 = vmatpush3.bf16.msra.mxu0 %v220_v4 }
  0x21   :  { %200 = vmatprep.subr.bf16.mxu0 %v253_v0 }
  0x24   :  { %201 = vmatpush3.bf16.msra.mxu0 %v221_v5 }
  0x25   :  { %202 = vmatprep.subr.bf16.mxu0 %v253_v0 }
  0x28   :  { %203 = vmatpush3.bf16.msra.mxu0 %v222_v6 }
  0x29   :  { %204 = vmatprep.subr.bf16.mxu0 %v253_v0 }
  0x2c   :  { %205 = vmatpush3.bf16.msra.mxu0 %v223_v7 }
  0x2d   :  { %206 = vmatprep.subr.bf16.mxu0 %v253_v0 }
  0x30   :  { %207 = vmatpush3.bf16.msra.mxu0 %v224_v8 }
  0x33   :  { %209 = vmatmul.mubr.bf16.vlgmr.msra.gmra.mrb[0].mxu0 %v225_v9 }
 0x106   :  { %v142_v11 = vpop.f32.mrb[0].mxu0 }
 0x107   :  { %v210_v12 = vpop.f32.mrb[1].mxu0  ;;  %v143_v14 = vadd.f32 %v164_v10, %v142_v11 }
 0x108   :  { %v145_v13 = vpop.f32.mrb[2].mxu0 }
 0x109   :  { %v146_v15 = vadd.f32 %v164_v10, %v145_v13  ;;  %v211_v16 = vpop.f32.mrb[3].mxu0 }
 0x10b   :  { %v181_v17 = vpack.c.bf16 %v146_v15, %v143_v14 }
 0x10d   :  { %182 = vst [vmem:[%s299_s3] sm:$0xff] %v181_v17  }
 0x10e   :  { %163 = vsyncpa [#allocation3], 1 }

</bundles_post_ra>
